<compile_context>
chip_gen: v7x
topology: tpu7x:2x2x1
jax: 0.10.0
libtpu: 0.0.40
codegen_flags: <defaults>
</compile_context>

<pallas_src>
import functools

import jax
import jax.numpy as jnp
from jax.experimental import pallas as pl
from jax.experimental.pallas import tpu as pltpu


def _round_up(x, m):
    return ((x + m - 1) // m) * m


# --------------------------------------------------------------------------
# Fused kernel: init linear + stacked graph-conv layers, Bt graphs per step.
# --------------------------------------------------------------------------

def _mgcn_kernel(nf_ref, adj_ref, w0_ref, wl_ref, bl_ref, o_ref, *, num_layers):
    """One block of Bt graphs flattened to M = Bt*N rows.

    nf_ref : (1, M, Fp)   node features (feature dim zero-padded), compute dtype
    adj_ref: (1, M, M)    block-diagonal normalized adjacency, compute dtype
    w0_ref : (Fp, Dp)     init_transform weight (bias-free), compute dtype
    wl_ref : (L, Dp, Dp)  stacked GCN layer weights, compute dtype
    bl_ref : (L, 1, Dp)   stacked GCN layer biases, f32
    o_ref  : (1, M, Ho)   output, Ho = hidden_feats[-1]
    """
    a = adj_ref[0]                                               # (M, M)

    # init_transform: one lane-dense (M, Fp) @ (Fp, Dp) MXU matmul, f32 accum.
    h = jnp.dot(nf_ref[0], w0_ref[...], preferred_element_type=jnp.float32)

    for l in range(num_layers):
        w = wl_ref[l]                                            # (Dp, Dp)
        b = bl_ref[l]                                            # (1, Dp)  f32
        hc = h.astype(w.dtype)
        # Aggregate then project: both are full-height lane-dense MXU matmuls.
        ah = jnp.dot(a, hc, preferred_element_type=jnp.float32)
        hw = jnp.dot(ah.astype(w.dtype), w, preferred_element_type=jnp.float32)
        h = jnp.maximum(hw + b, 0.0)                             # ReLU, f32

    o_ref[0] = h[:, :o_ref.shape[-1]].astype(o_ref.dtype)


def _choose_block_graphs(B, N):
    """Graphs per grid step: target Bt*N ~= 128 MXU rows, keep >=2 steps if B allows."""
    target = max(1, 128 // max(N, 1))
    divisors = [d for d in range(1, B + 1) if B % d == 0]
    cands = [d for d in divisors if d <= target] or [1]
    bt = max(cands)
    if B >= 2 and B // bt < 2:                 # keep >=2 steps for v7x megacore
        two_step = [d for d in cands if B // d >= 2]
        if two_step:
            bt = max(two_step)
    return bt


def molecular_gcn(node_feats, adj, params, *, compute_dtype=jnp.bfloat16,
                  out_dtype=jnp.float32, block_graphs=None):
    """node_feats: (B, N, F); adj: (B, N, N) normalized; returns (B, N, hidden[-1])."""
    B, N, F = node_feats.shape
    w0 = params["init_w"]
    layers = params["gcn_layers"]
    num_layers = len(layers)
    assert num_layers >= 1, "MolecularGCN requires non-empty hidden_feats"
    d0 = w0.shape[1]
    h_last = layers[-1][0].shape[1]

    Bt = block_graphs or _choose_block_graphs(B, N)
    assert B % Bt == 0
    G = B // Bt
    M = Bt * N

    # Lane-dense padded widths (multiples of 128).
    Fp = _round_up(F, 128)
    Dp = _round_up(max([d0] + [w.shape[1] for w, _ in layers]), 128)

    # Node features: (B, N, F) -> (G, M, Fp), zero-padded feature dim.
    nf = node_feats.astype(compute_dtype)
    if Fp != F:
        nf = jnp.pad(nf, ((0, 0), (0, 0), (0, Fp - F)))
    nf = nf.reshape(G, M, Fp)

    # Adjacency: (B, N, N) -> block-diagonal (G, M, M) so A@H is ONE matmul.
    # TODO(synk): for large-N graphs (N >= 128) a batched einsum path (no
    #             block-diag zero-fill) would waste fewer flops.
    adj_c = adj.astype(compute_dtype).reshape(G, Bt, N, N)
    adj_blk = jnp.zeros((G, M, M), compute_dtype)
    for t in range(Bt):
        adj_blk = adj_blk.at[:, t * N:(t + 1) * N, t * N:(t + 1) * N].set(adj_c[:, t])

    # init_transform weight: (F, D0) -> (Fp, Dp), zero-padded.
    w0p = jnp.zeros((Fp, Dp), compute_dtype).at[:F, :d0].set(w0.astype(compute_dtype))

    # GCN layer weights / biases stacked into single resident arrays.
    wl = jnp.zeros((num_layers, Dp, Dp), compute_dtype)
    bl = jnp.zeros((num_layers, 1, Dp), jnp.float32)
    for l, (w, b) in enumerate(layers):
        k, h = w.shape
        wl = wl.at[l, :k, :h].set(w.astype(compute_dtype))
        bl = bl.at[l, 0, :h].set(b.astype(jnp.float32))

    kernel = functools.partial(_mgcn_kernel, num_layers=num_layers)

    flops = 2 * G * (M * Fp * Dp + num_layers * (M * M * Dp + M * Dp * Dp))
    bytes_accessed = (nf.size * nf.dtype.itemsize
                      + adj_blk.size * adj_blk.dtype.itemsize
                      + w0p.size * w0p.dtype.itemsize
                      + wl.size * wl.dtype.itemsize
                      + bl.size * bl.dtype.itemsize
                      + B * N * h_last * jnp.dtype(out_dtype).itemsize)

    out = pl.pallas_call(
        kernel,
        out_shape=jax.ShapeDtypeStruct((G, M, h_last), out_dtype),
        grid=(G,),
        in_specs=[
            pl.BlockSpec((1, M, Fp), lambda g: (g, 0, 0)),
            pl.BlockSpec((1, M, M), lambda g: (g, 0, 0)),
            pl.BlockSpec((Fp, Dp), lambda g: (0, 0)),               # resident
            pl.BlockSpec((num_layers, Dp, Dp), lambda g: (0, 0, 0)),  # resident
            pl.BlockSpec((num_layers, 1, Dp), lambda g: (0, 0, 0)),   # resident
        ],
        out_specs=pl.BlockSpec((1, M, h_last), lambda g: (g, 0, 0)),
        compiler_params=pltpu.CompilerParams(
            dimension_semantics=("parallel",)),      # megacore sharding on v7x
        cost_estimate=pl.CostEstimate(flops=flops, transcendentals=0,
                                      bytes_accessed=bytes_accessed),
    )(nf, adj_blk, w0p, wl, bl)

    return out.reshape(B, N, h_last)


# --------------------------------------------------------------------------
# Pure-JAX reference (same math, f32)
# --------------------------------------------------------------------------

def molecular_gcn_ref(node_feats, adj, params):
    h = node_feats @ params["init_w"]
    for w, b in params["gcn_layers"]:
        h = jax.nn.relu(jnp.einsum("bij,bjk->bik", adj, h) @ w + b)
    return h


# --------------------------------------------------------------------------
# Deterministic parameter init
# --------------------------------------------------------------------------

def init_params(key, in_feats, dim_embedding, hidden_feats):
    n_layers = len(hidden_feats)
    keys = jax.random.split(key, 1 + 2 * n_layers)

    w0 = (jax.random.normal(keys[0], (in_feats, dim_embedding), jnp.float32)
          / jnp.sqrt(float(in_feats)))
    # Literal PyTorch `weight[-1].fill_(0)` on a (out, in) weight == zero last
    # OUTPUT unit == last column in (in, out) layout.
    w0 = w0.at[:, -1].set(0.0)

    layers = []
    dims = [dim_embedding] + list(hidden_feats)
    for i in range(n_layers):
        kw, kb = keys[1 + 2 * i], keys[2 + 2 * i]
        w = (jax.random.normal(kw, (dims[i], dims[i + 1]), jnp.float32)
             / jnp.sqrt(float(dims[i])))
        b = jax.random.normal(kb, (dims[i + 1],), jnp.float32) * 0.01
        layers.append((w, b))
    return {"init_w": w0, "gcn_layers": layers}


# --------------------------------------------------------------------------
# Main
# --------------------------------------------------------------------------

if __name__ == "__main__":
    in_feats = 64
    dim_embedding = 128            # module default
    hidden_feats = [128, 128]      # lane-dense hidden widths
    B, N = 8, 32                   # 8 graphs, 32 (padded) nodes each
                                   # -> 4 graphs/step (128 MXU rows), 2 grid steps

    key = jax.random.PRNGKey(0)
    kp, kn, ka = jax.random.split(key, 3)
    params = init_params(kp, in_feats, dim_embedding, hidden_feats)

    node_feats = jax.random.normal(kn, (B, N, in_feats), jnp.float32)

    # Dense batched adjacency with self-loops, symmetric normalization.
    a = (jax.random.uniform(ka, (B, N, N)) > 0.7).astype(jnp.float32)
    a = jnp.minimum(a + jnp.swapaxes(a, 1, 2) + jnp.eye(N, dtype=jnp.float32), 1.0)
    dinv = 1.0 / jnp.sqrt(jnp.sum(a, axis=-1))
    adj = a * dinv[:, :, None] * dinv[:, None, :]

    ref = molecular_gcn_ref(node_feats, adj, params)

    # Structural correctness check with f32 compute (tight tolerance).
    out_f32 = molecular_gcn(node_feats, adj, params, compute_dtype=jnp.float32)
    out_f32 = jax.block_until_ready(out_f32)
    assert out_f32.shape == (B, N, hidden_feats[-1])
    assert jnp.allclose(out_f32, ref, atol=1e-2, rtol=1e-2)

    # Optimized bf16 path (default) — lenient sanity check.
    out = molecular_gcn(node_feats, adj, params)
    out = jax.block_until_ready(out)
    assert out.shape == (B, N, hidden_feats[-1])
    assert float(jnp.max(jnp.abs(out - ref))) < 0.5

    print("KERNEL_OK")
</pallas_src>

<mosaic_0001>
module attributes {stable_mosaic.version = 11 : i64} {
  func.func @_mgcn_kernel(%arg0: i32, %arg1: memref<1x128x128xf32, #tpu.memory_space<vmem>>, %arg2: memref<1x128x128xf32, #tpu.memory_space<vmem>>, %arg3: memref<128x128xf32, #tpu.memory_space<vmem>>, %arg4: memref<2x128x128xf32, #tpu.memory_space<vmem>>, %arg5: memref<2x1x128xf32, #tpu.memory_space<vmem>>, %arg6: memref<1x128x128xf32, #tpu.memory_space<vmem>>) attributes {dimension_semantics = [#tpu.dimension_semantics<parallel>], iteration_bounds = array<i64: 2>, scalar_prefetch = 0 : i64, scratch_operands = 0 : i64, tpu.core_type = #tpu.core_type<tc>, window_params = [{transform_indices = @transform_0, window_bounds = array<i64: 1, 128, 128>}, {transform_indices = @transform_1, window_bounds = array<i64: 1, 128, 128>}, {pipeline_mode = #tpu.pipeline_mode<synchronous>, transform_indices = @transform_2, window_bounds = array<i64: 128, 128>}, {pipeline_mode = #tpu.pipeline_mode<synchronous>, transform_indices = @transform_3, window_bounds = array<i64: 2, 128, 128>}, {pipeline_mode = #tpu.pipeline_mode<synchronous>, transform_indices = @transform_4, window_bounds = array<i64: 2, 1, 128>}, {transform_indices = @transform_5, window_bounds = array<i64: 1, 128, 128>}]} {
    %c0 = arith.constant 0 : index
    %c0_0 = arith.constant 0 : index
    %c0_1 = arith.constant 0 : index
    %0 = vector.load %arg2[%c0, %c0_0, %c0_1] : memref<1x128x128xf32, #tpu.memory_space<vmem>>, vector<1x128x128xf32>
    %1 = vector.shape_cast %0 : vector<1x128x128xf32> to vector<128x128xf32>
    %c0_2 = arith.constant 0 : index
    %c0_3 = arith.constant 0 : index
    %c0_4 = arith.constant 0 : index
    %2 = vector.load %arg1[%c0_2, %c0_3, %c0_4] : memref<1x128x128xf32, #tpu.memory_space<vmem>>, vector<1x128x128xf32>
    %3 = vector.shape_cast %2 : vector<1x128x128xf32> to vector<128x128xf32>
    %c0_5 = arith.constant 0 : index
    %c0_6 = arith.constant 0 : index
    %4 = vector.load %arg3[%c0_5, %c0_6] : memref<128x128xf32, #tpu.memory_space<vmem>>, vector<128x128xf32>
    %cst = arith.constant dense<0.000000e+00> : vector<128x128xf32>
    %5 = tpu.matmul %3, %4, %cst {dimension_numbers = #tpu.dot_dimension_numbers<[1], [0], [0], [1], [0, 0, 1, 1], [], []>} : vector<128x128xf32>, vector<128x128xf32>, vector<128x128xf32> -> vector<128x128xf32>
    %c0_7 = arith.constant 0 : index
    %c0_8 = arith.constant 0 : index
    %c0_9 = arith.constant 0 : index
    %6 = vector.load %arg4[%c0_7, %c0_8, %c0_9] : memref<2x128x128xf32, #tpu.memory_space<vmem>>, vector<1x128x128xf32>
    %7 = vector.shape_cast %6 : vector<1x128x128xf32> to vector<128x128xf32>
    %c0_10 = arith.constant 0 : index
    %c0_11 = arith.constant 0 : index
    %c0_12 = arith.constant 0 : index
    %8 = vector.load %arg5[%c0_10, %c0_11, %c0_12] : memref<2x1x128xf32, #tpu.memory_space<vmem>>, vector<1x1x128xf32>
    %9 = vector.shape_cast %8 : vector<1x1x128xf32> to vector<1x128xf32>
    %cst_13 = arith.constant dense<0.000000e+00> : vector<128x128xf32>
    %10 = tpu.matmul %1, %5, %cst_13 {dimension_numbers = #tpu.dot_dimension_numbers<[1], [0], [0], [1], [0, 0, 1, 1], [], []>} : vector<128x128xf32>, vector<128x128xf32>, vector<128x128xf32> -> vector<128x128xf32>
    %cst_14 = arith.constant dense<0.000000e+00> : vector<128x128xf32>
    %11 = tpu.matmul %10, %7, %cst_14 {dimension_numbers = #tpu.dot_dimension_numbers<[1], [0], [0], [1], [0, 0, 1, 1], [], []>} : vector<128x128xf32>, vector<128x128xf32>, vector<128x128xf32> -> vector<128x128xf32>
    %12 = vector.broadcast %9 : vector<1x128xf32> to vector<128x128xf32>
    %13 = arith.addf %11, %12 : vector<128x128xf32>
    %cst_15 = arith.constant 0.000000e+00 : f32
    %14 = vector.broadcast %cst_15 : f32 to vector<128x128xf32>
    %15 = arith.maximumf %13, %14 : vector<128x128xf32>
    %c1 = arith.constant 1 : index
    %c0_16 = arith.constant 0 : index
    %c0_17 = arith.constant 0 : index
    %16 = vector.load %arg4[%c1, %c0_16, %c0_17] : memref<2x128x128xf32, #tpu.memory_space<vmem>>, vector<1x128x128xf32>
    %17 = vector.shape_cast %16 : vector<1x128x128xf32> to vector<128x128xf32>
    %c1_18 = arith.constant 1 : index
    %c0_19 = arith.constant 0 : index
    %c0_20 = arith.constant 0 : index
    %18 = vector.load %arg5[%c1_18, %c0_19, %c0_20] : memref<2x1x128xf32, #tpu.memory_space<vmem>>, vector<1x1x128xf32>
    %19 = vector.shape_cast %18 : vector<1x1x128xf32> to vector<1x128xf32>
    %cst_21 = arith.constant dense<0.000000e+00> : vector<128x128xf32>
    %20 = tpu.matmul %1, %15, %cst_21 {dimension_numbers = #tpu.dot_dimension_numbers<[1], [0], [0], [1], [0, 0, 1, 1], [], []>} : vector<128x128xf32>, vector<128x128xf32>, vector<128x128xf32> -> vector<128x128xf32>
    %cst_22 = arith.constant dense<0.000000e+00> : vector<128x128xf32>
    %21 = tpu.matmul %20, %17, %cst_22 {dimension_numbers = #tpu.dot_dimension_numbers<[1], [0], [0], [1], [0, 0, 1, 1], [], []>} : vector<128x128xf32>, vector<128x128xf32>, vector<128x128xf32> -> vector<128x128xf32>
    %22 = vector.broadcast %19 : vector<1x128xf32> to vector<128x128xf32>
    %23 = arith.addf %21, %22 : vector<128x128xf32>
    %cst_23 = arith.constant 0.000000e+00 : f32
    %24 = vector.broadcast %cst_23 : f32 to vector<128x128xf32>
    %25 = arith.maximumf %23, %24 : vector<128x128xf32>
    %c0_24 = arith.constant 0 : index
    %c0_25 = arith.constant 0 : index
    %c0_26 = arith.constant 0 : index
    %26 = vector.load %arg6[%c0_24, %c0_25, %c0_26] : memref<1x128x128xf32, #tpu.memory_space<vmem>>, vector<1x128x128xf32>
    %27 = vector.shape_cast %26 : vector<1x128x128xf32> to vector<128x128xf32>
    %28 = vector.shape_cast %25 : vector<128x128xf32> to vector<1x128x128xf32>
    tpu.vector_store %arg6[%c0_24, %c0_25, %c0_26], %28 {strides = array<i32>} : memref<1x128x128xf32, #tpu.memory_space<vmem>>, vector<1x128x128xf32>,
    return
  }
  func.func @transform_0(%arg0: i32) -> (i32, i32, i32) {
    %c0_i32 = arith.constant 0 : i32
    %c0_i32_0 = arith.constant 0 : i32
    %c0_i32_1 = arith.constant 0 : i32
    return %arg0, %c0_i32, %c0_i32_0 : i32, i32, i32
  }
  func.func @transform_1(%arg0: i32) -> (i32, i32, i32) {
    %c0_i32 = arith.constant 0 : i32
    %c0_i32_0 = arith.constant 0 : i32
    %c0_i32_1 = arith.constant 0 : i32
    return %arg0, %c0_i32, %c0_i32_0 : i32, i32, i32
  }
  func.func @transform_2(%arg0: i32) -> (i32, i32) {
    %c0_i32 = arith.constant 0 : i32
    %c0_i32_0 = arith.constant 0 : i32
    %c0_i32_1 = arith.constant 0 : i32
    return %c0_i32, %c0_i32_0 : i32, i32
  }
  func.func @transform_3(%arg0: i32) -> (i32, i32, i32) {
    %c0_i32 = arith.constant 0 : i32
    %c0_i32_0 = arith.constant 0 : i32
    %c0_i32_1 = arith.constant 0 : i32
    %c0_i32_2 = arith.constant 0 : i32
    return %c0_i32, %c0_i32_0, %c0_i32_1 : i32, i32, i32
  }
  func.func @transform_4(%arg0: i32) -> (i32, i32, i32) {
    %c0_i32 = arith.constant 0 : i32
    %c0_i32_0 = arith.constant 0 : i32
    %c0_i32_1 = arith.constant 0 : i32
    %c0_i32_2 = arith.constant 0 : i32
    return %c0_i32, %c0_i32_0, %c0_i32_1 : i32, i32, i32
  }
  func.func @transform_5(%arg0: i32) -> (i32, i32, i32) {
    %c0_i32 = arith.constant 0 : i32
    %c0_i32_0 = arith.constant 0 : i32
    %c0_i32_1 = arith.constant 0 : i32
    return %arg0, %c0_i32, %c0_i32_0 : i32, i32, i32
  }
}

</mosaic_0001>

<bundles_post_ra>
// kernel: tpu_custom_call.1
= control target key start
LH: loop header
LB: loop body
LE: loop exit
PB: predicated region body
PF: predicated region fallthrough
CT: control target
= control target key end

     0   :  { %s2771_s0 = inlined_call_operand.hbm [shape: f32[2,128,128], index: 0, kind: input, shape index: {}]   ;;  %s2772_s1 = inlined_call_operand.hbm [shape: f32[2,128,128], index: 1, kind: input, shape index: {}]   ;;  %s2773_s2 = inlined_call_operand.hbm [shape: f32[128,128], index: 2, kind: input, shape index: {}]   ;;  %s2774_s3 = inlined_call_operand.hbm [shape: f32[2,128,128], index: 3, kind: input, shape index: {}]   ;;  %s2775_s4 = inlined_call_operand.vmem [shape: f32[2,1,128], index: 4, kind: input, shape index: {}]   ;;  %s2776_s5 = inlined_call_operand.hbm [shape: f32[2,128,128], index: 5, kind: output, shape index: {}]  }
   0x1   :  { %2784 = sst [smem:[#allocation16_spill]] %s2771_s0 }
   0x2   :  { %2785 = sst [smem:[#allocation17_spill]] %s2773_s2 }
   0x3   :  { %10 = vsyncpa [#allocation3], 0 }
   0x4   :  { %12 = vsyncpa [#allocation3 + $0x1], 0 }
   0x5   :  { %13 = vsyncpa [#allocation6], 0 }
   0x6   :  { %15 = vsyncpa [#allocation6 + $0x1], 0 }
   0x7   :  { %16 = vsyncpa [#allocation9], 0 }
   0x8   :  { %17 = vsyncpa [#allocation4], 0 }
   0x9   :  { %19 = vsyncpa [#allocation4 + $0x1], 0  ;;  %s2265_s18 = smov 0   ;;  %s2267_s19 = smov 0  }
   0xa   :  { %s2269_s20 = smov 0   ;;  %s2271_s21 = smov 0  }
   0xb LB: > { %s2286_s22 = sadd.s32 4294967295, %s2224_s21   ;;  %s1310_s23 = sadd.s32 4294967294, %s2224_s21   ;;  %s2224_s21 = sphi %s2271_s21, %s2808_s21   ;;  %s2220_s20 = sphi %s2269_s20, %s2807_s20   ;;  %s2216_s19 = sphi %s2267_s19, %s2806_s19   ;;  %s2212_s18 = sphi %s2265_s18, %s2805_s18  }
   0xc   : > { %p45_p0 = scmp.ne.s32.totalorder %s2216_s19, %s2212_s18  ;;  %p2777_p1 = scmp.eq.s32.totalorder %s2286_s22, 0 }
   0xd   : > { %p164_p3 = scmp.eq.s32.totalorder %s1310_s23, 1  ;;  %p1311_p5 = scmp.ge.s32.totalorder %s2224_s21, 1 }
   0xe   : > { %p2295_p4 = por %p2777_p1, %p45_p0  ;;  %p171_p7 = scmp.lt.s32.totalorder %s2224_s21, 3 }
   0xf   : > { %p2300_p6 = por %p164_p3, %p45_p0  ;;  %s2226_s27 = smov [#allocation7]  }
  0x10   : > { %s2786_s24 = scalar_select %p2295_p4, 1, 0 }
  0x11   : > { %s2787_s25 = scalar_select %p2300_p6, 1, 0 }
  0x12   : > { %p2305_p8 = pnand %p1311_p5, %p171_p7  ;;  %s183_s28 = sshll.u32 %s2226_s27, 4  ;;  %s2309_s28 = int_to_ptr.vmem [resolvable:$true] %s183_s28 }
  0x13   : > { %s2227_s30 = smov [#allocation8]   ;;  %s2790_s2 = sld [smem:[#allocation17_spill]] }
  0x14   : > { %p1968_p9 = pneg %p2305_p8  ;;  %s196_s6 = sshll.u32 %s2227_s30, 4  ;;  %s2320_s6 = int_to_ptr.vmem [resolvable:$true] %s196_s6 }
  0x16   : > { %p2316_p11 = pnand %p1968_p9, %p2777_p1 }
  0x18   : > { %p2032_p13 = pneg %p2316_p11 }
  0x19   : > { %s2030_s9 = scalar_lea.hbm %s2790_s2, 2048 }
  0x1a   : > { %p2031_p12 = scmp.ne.s32.totalorder %s2790_s2, %s2030_s9  ;;  %p2037_p5 = scmp.lt.u32.totalorder %s2030_s9, %s2790_s2 }
  0x1c   : > { %p2033_p0 = pnand %p2032_p13, %p2031_p12 }
  0x1e   : > { %p2034_p3 = pneg %p2033_p0 }
  0x20   : > { %p2039_p7 = pnand %p2037_p5, %p2034_p3 }
  0x22   : > { %2042 = shalt.err (!%p2039_p7)
}
  0x23   : > { %s2043_s14 = scalar_lea.vmem %s2309_s28, 2048  ;;  %p2051_p2 = scmp.lt.s32.totalorder %s2309_s28, %s2309_s28 }
  0x24   : > { %p2044_p9 = scmp.ne.s32.totalorder %s2309_s28, %s2043_s14  ;;  %p2052_p12 = scmp.lt.s32.totalorder %s2043_s14, %s2043_s14 }
  0x26   : > { %p2046_p10 = pnand %p2044_p9, %p2032_p13  ;;  %p2053_p0 = por %p2052_p12, %p2051_p2 }
  0x28   : > { %p2047_p1 = pneg %p2046_p10 }
  0x2a   : > { %p2054_p6 = pnand %p2053_p0, %p2047_p1 }
  0x2c   : > { %2057 = shalt.err (!%p2054_p6)
}
  0x2d   : > { %s2778_s15 = smov 128   ;;  %s2780_s16 = smov 8  }
  0x2e   : > { %1971 = dma.hbm_to_vmem [thread:$0]  (!%p2316_p11), %s2790_s2, 2048, %s2309_s28, [#allocation6], %s2778_s15, %s2778_s15, %s2780_s16  }
  0x2f   : > { %s2058_s7 = scalar_lea.hbm %s2774_s3, 4096 }
  0x30   : > { %p2059_p1 = scmp.ne.s32.totalorder %s2774_s3, %s2058_s7  ;;  %p2065_p10 = scmp.lt.u32.totalorder %s2058_s7, %s2774_s3 }
  0x32   : > { %p2061_p2 = pnand %p2059_p1, %p2032_p13 }
  0x34   : > { %p2062_p6 = pneg %p2061_p2 }
  0x36   : > { %p2067_p3 = pnand %p2065_p10, %p2062_p6 }
  0x38   : > { %2070 = shalt.err (!%p2067_p3)
}
  0x39   : > { %s2071_s28 = scalar_lea.vmem %s2320_s6, 4096  ;;  %p2079_p12 = scmp.lt.s32.totalorder %s2320_s6, %s2320_s6 }
  0x3a   : > { %p2072_p5 = scmp.ne.s32.totalorder %s2320_s6, %s2071_s28  ;;  %p2080_p0 = scmp.lt.s32.totalorder %s2071_s28, %s2071_s28 }
  0x3c   : > { %p2074_p7 = pnand %p2072_p5, %p2032_p13  ;;  %p2081_p1 = por %p2080_p0, %p2079_p12 }
  0x3e   : > { %p2075_p9 = pneg %p2074_p7 }
  0x40   : > { %p2082_p2 = pnand %p2081_p1, %p2075_p9 }
  0x42   : > { %2085 = shalt.err (!%p2082_p2)
}
  0x43   : > { %1974 = dma.hbm_to_vmem [thread:$0]  (!%p2316_p11), %s2774_s3, 4096, %s2320_s6, [#allocation9], %s2778_s15, %s2778_s15, %s2780_s16  }
  0x44   : > { %s2381_s29 = sadd.s32 1, %s2224_s21   ;;  %s32_s14 = sadd.s32 1, %s2220_s20 }
  0x45   : > { %s29_s17 = ssub.s32 %s2224_s21, %s2381_s29  ;;  %p39_p13 = scmp.ne.s32.totalorder %s2220_s20, %s2216_s19 }
  0x46   : > { %p30_p6 = scmp.eq.s32.totalorder %s29_s17, 0  ;;  %p40_p10 = scmp.eq.s32.totalorder %s2224_s21, 0 }
  0x47   : > { %p2791_p3 = scmp.eq.s32.totalorder %s2286_s22, 1  ;;  %p1988_p7 = scmp.lt.s32.totalorder %s2224_s21, 2 }
  0x48   : > { %s2397_s27 = scalar_select %p30_p6, %s2220_s20, %s32_s14  }
  0x49   : > { %p2391_p5 = por %p2791_p3, %p39_p13  ;;  %p41_p9 = por %p40_p10, %p39_p13 }
  0x4a   : > { %s213_s30 = sand.u32 1, %s2220_s20   ;;  %s1335_s6 = sshll.u32 %s2224_s21, 11 }
  0x4b   : > { %s2792_s23 = scalar_select %p2391_p5, 1, 0 }
  0x4c   : > { %s1315_s7 = sshll.u32 %s213_s30, 7  ;;  %s2793_s0 = sld [smem:[#allocation16_spill]] }
  0x4d   : > { %s217_s11 = scalar_lea.vmem [#allocation2], %s1315_s7  ;;  %p2408_p11 = pnand %p1988_p7, %p41_p9 }
  0x4e   : > { %s224_s28 = sshll.u32 %s217_s11, 4  ;;  %s2415_s17 = scalar_lea.hbm %s2772_s1, %s1335_s6  ;;  %s2406_s28 = int_to_ptr.vmem [resolvable:$true] %s224_s28 }
  0x4f   : > { %s238_s8 = scalar_lea.vmem [#allocation5], %s1315_s7  ;;  %s2419_s15 = scalar_lea.sflag [#allocation3], %s213_s30 }
  0x50   : > { %s2417_s9 = sshll.u32 %s238_s8, 4  ;;  %p2088_p0 = pneg %p2408_p11  ;;  %s2451_s9 = int_to_ptr.vmem [resolvable:$true] %s2417_s9 }
  0x52   : > { %s2404_s10 = scalar_lea.hbm %s2793_s0, %s1335_s6  ;;  %s2091_s13 = scalar_lea.hbm %s2793_s0, 4096 }
  0x53   : > { %s2086_s11 = scalar_lea.hbm %s2404_s10, 2048  ;;  %p2092_p13 = scmp.lt.u32.totalorder %s2404_s10, %s2793_s0 }
  0x54   : > { %p2087_p12 = scmp.ne.s32.totalorder %s2404_s10, %s2086_s11  ;;  %p2093_p6 = scmp.lt.u32.totalorder %s2091_s13, %s2086_s11 }
  0x55   : > { %p2095_p3 = scmp.lt.u32.totalorder %s2086_s11, %s2404_s10 }
  0x56   : > { %p2089_p1 = pnand %p2088_p0, %p2087_p12  ;;  %p2094_p10 = por %p2093_p6, %p2092_p13 }
  0x58   : > { %p2090_p2 = pneg %p2089_p1  ;;  %p2096_p7 = por %p2095_p3, %p2094_p10 }
  0x5a   : > { %p2097_p9 = pnand %p2096_p7, %p2090_p2 }
  0x5c   : > { %2100 = shalt.err (!%p2097_p9)
}
  0x5d   : > { %s2101_s30 = scalar_lea.vmem %s2406_s28, 2048  ;;  %s2230_s2 = smov [#allocation2]  }
  0x5e   : > { %p2102_p12 = scmp.ne.s32.totalorder %s2406_s28, %s2101_s30  ;;  %s2106_s16 = sshll.u32 %s2230_s2, 4  ;;  %s2107_s16 = int_to_ptr.vmem [resolvable:$false] %s2106_s16 }
  0x5f   : > { %s2108_s7 = scalar_lea.vmem %s2107_s16, 4096  ;;  %p2109_p4 = scmp.lt.s32.totalorder %s2406_s28, %s2107_s16 }
  0x60   : > { %p2104_p1 = pnand %p2102_p12, %p2088_p0  ;;  %p2110_p13 = scmp.lt.s32.totalorder %s2108_s7, %s2101_s30 }
  0x62   : > { %p2105_p5 = pneg %p2104_p1  ;;  %p2111_p6 = por %p2110_p13, %p2109_p4 }
  0x64   : > { %p2112_p10 = pnand %p2111_p6, %p2105_p5 }
  0x66   : > { %2115 = shalt.err (!%p2112_p10)
}
  0x67   : > { %s2795_s8 = smov 8   ;;  %s2796_s11 = smov 128  }
  0x68   : > { %1978 = dma.hbm_to_vmem [thread:$0]  (!%p2408_p11), %s2404_s10, 2048, %s2406_s28, %s2419_s15, %s2796_s11, %s2796_s11, %s2795_s8  }
  0x69   : > { %s234_s13 = sand.u32 1, %s2224_s21   ;;  %s2116_s6 = scalar_lea.hbm %s2415_s17, 2048 }
  0x6a   : > { %s2454_s14 = scalar_lea.sflag [#allocation6], %s234_s13  ;;  %p2117_p4 = scmp.ne.s32.totalorder %s2415_s17, %s2116_s6 }
  0x6b   : > { %s2121_s16 = scalar_lea.hbm %s2772_s1, 4096  ;;  %p2122_p3 = scmp.lt.u32.totalorder %s2415_s17, %s2772_s1 }
  0x6c   : > { %p2119_p5 = pnand %p2117_p4, %p2088_p0  ;;  %p2123_p7 = scmp.lt.u32.totalorder %s2121_s16, %s2116_s6 }
  0x6d   : > { %p2125_p12 = scmp.lt.u32.totalorder %s2116_s6, %s2415_s17 }
  0x6e   : > { %p2120_p2 = pneg %p2119_p5  ;;  %p2124_p9 = por %p2123_p7, %p2122_p3 }
  0x70   : > { %p2126_p1 = por %p2125_p12, %p2124_p9 }
  0x72   : > { %p2127_p13 = pnand %p2126_p1, %p2120_p2 }
  0x74   : > { %2130 = shalt.err (!%p2127_p13)
}
  0x75   : > { %s2131_s15 = scalar_lea.vmem %s2451_s9, 2048  ;;  %s2231_s10 = smov [#allocation5]  }
  0x76   : > { %p2132_p6 = scmp.ne.s32.totalorder %s2451_s9, %s2131_s15  ;;  %s2136_s28 = sshll.u32 %s2231_s10, 4  ;;  %s2137_s28 = int_to_ptr.vmem [resolvable:$false] %s2136_s28 }
  0x77   : > { %s2138_s0 = scalar_lea.vmem %s2137_s28, 4096  ;;  %p2139_p5 = scmp.lt.s32.totalorder %s2451_s9, %s2137_s28 }
  0x78   : > { %p2134_p10 = pnand %p2132_p6, %p2088_p0  ;;  %p2140_p3 = scmp.lt.s32.totalorder %s2138_s0, %s2131_s15 }
  0x7a   : > { %p2135_p4 = pneg %p2134_p10  ;;  %p2141_p7 = por %p2140_p3, %p2139_p5 }
  0x7c   : > { %p2142_p9 = pnand %p2141_p7, %p2135_p4 }
  0x7e   : > { %2145 = shalt.err (!%p2142_p9)
}
  0x7f   : > { %1981 = dma.hbm_to_vmem [thread:$0]  (!%p2408_p11), %s2415_s17, 2048, %s2451_s9, %s2454_s14, %s2796_s11, %s2796_s11, %s2795_s8  }
  0x80   : > { %257 = sbr.rel (%p2305_p8) target bundleno = 1366 (0x556), region = 40  ;;  %s2486_s13 = sand.u32 (!%p2305_p8), 1, %s2216_s19  }
  0x81   : > { %s2489_s6 = sshll.u32 (!%p2305_p8), %s2486_s13, 7  ;;  %s260_s12 = scalar_lea.sflag (!%p2305_p8), [#allocation3], %s2486_s13 }
  0x82   : > { %s2493_s30 = scalar_lea.vmem (!%p2305_p8), [#allocation2], %s2489_s6  ;;  %p2797_p0 = scmp.ne.s32.totalorder (!%p2305_p8), %s2786_s24, 0 }
  0x87   : > { %2191 = dma.done.wait (%p2797_p0), %s260_s12, 2048  }
  0x88   : > { %2193 = vsyncadd (%p2797_p0), %s260_s12, 4294965248  ;;  %s268_s26 = sand.u32 1, %s2286_s22   ;;  %s2501_s9 = scalar_lea.vmem [#allocation5], %s2489_s6 }
  0x89   : > { %s269_s17 = scalar_lea.sflag [#allocation6], %s268_s26 }
  0x8a   : > { %2195 = dma.done.wait (%p2797_p0), %s269_s17, 2048  }
  0x8b   : > { %2197 = vsyncadd (%p2797_p0), %s269_s17, 4294965248  ;;  %p2798_p8 = scmp.eq.s32.totalorder %s2286_s22, 0 }
  0x8d   : > { %2199 = dma.done.wait (%p2798_p8), [#allocation6], 2048   ;;  %p2799_p11 = pmov %p2798_p8 }
  0x8e   : > { %p2800_p2 = pmov %p2798_p8 }
  0x8f   : > { %2201 = vsyncadd (%p2799_p11), [#allocation6], 4294965248 }
  0x90   : > { %2203 = dma.done.wait (%p2800_p2), [#allocation9], 4096   ;;  %p2801_p12 = pmov %p2800_p2 }
  0x91   : > { %v344_v0 = vld [vmem:[#allocation7] sm:$0xff]  ;;  %v345_v1 = vld [vmem:[#allocation7 + $0x8] sm:$0xff]  ;;  %v346_v2 = vld [vmem:[#allocation7 + $0x10] sm:$0xff]  ;;  %s2688_s2 = scalar_lea.vmem [#allocation10], %s2489_s6  ;;  %s1337_s16 = sshll.u32 %s2286_s22, 11 }
  0x92   : > { %2205 = vsyncadd (%p2801_p12), [#allocation9], 4294963200  ;;  %v1778_v3 = vpack.c.bf16 %v345_v1, %v344_v0  ;;  %v347_v4 = vld [vmem:[#allocation7 + $0x18] sm:$0xff]  ;;  %v348_v6 = vld [vmem:[#allocation7 + $0x20] sm:$0xff]  ;;  %s1195_s7 = sshll.u32 %s2688_s2, 4  ;;  %s2723_s28 = scalar_lea.hbm %s2776_s5, %s1337_s16  ;;  %s2725_s7 = int_to_ptr.vmem [resolvable:$true] %s1195_s7 }
  0x93   : > { %v1782_v5 = vpack.c.bf16 %v347_v4, %v346_v2  ;;  %v349_v7 = vld [vmem:[#allocation7 + $0x28] sm:$0xff]  ;;  %v328_v9 = vld [vmem:[%s2493_s30] sm:$0xff]  ;;  %v350_v10 = vld [vmem:[#allocation7 + $0x30] sm:$0xff]  ;;  %s1182_s22 = scalar_lea.sflag [#allocation4], %s2486_s13  ;;  %s2146_s0 = scalar_lea.vmem %s2725_s7, 2048 }
  0x94   : > { %1779 = vmatprep.subr.bf16.mxu0 %v1778_v3  ;;  %v1786_v8 = vpack.c.bf16 %v349_v7, %v348_v6  ;;  %v351_v11 = vld [vmem:[#allocation7 + $0x38] sm:$0xff]  ;;  %1530 = vmatprep.mubr.f32.mxu0 %v328_v9  ;;  %v352_v13 = vld [vmem:[#allocation7 + $0x40] sm:$0xff]  ;;  %v353_v14 = vld [vmem:[#allocation7 + $0x48] sm:$0xff]  ;;  %p2147_p1 = scmp.ne.s32.totalorder %s2725_s7, %s2146_s0  ;;  %p2802_p13 = scmp.ne.s32.totalorder %s2792_s23, 0 }
  0x95   : > { %1781 = vmatpush3.bf16.msra.mxu0 %v1778_v3  ;;  %v1790_v12 = vpack.c.bf16 %v351_v11, %v350_v10  ;;  %v1794_v15 = vpack.c.bf16 %v353_v14, %v352_v13  ;;  %v354_v16 = vld [vmem:[#allocation7 + $0x50] sm:$0xff]  ;;  %v355_v17 = vld [vmem:[#allocation7 + $0x58] sm:$0xff]  ;;  %v356_v19 = vld [vmem:[#allocation7 + $0x60] sm:$0xff]  ;;  %s2232_s6 = smov [#allocation10]  }
  0x96   : > { %1783 = vmatprep.subr.bf16.mxu0 %v1782_v5  ;;  %v1798_v18 = vpack.c.bf16 %v355_v17, %v354_v16  ;;  %v357_v20 = vld [vmem:[#allocation7 + $0x68] sm:$0xff]  ;;  %v358_v22 = vld [vmem:[#allocation7 + $0x70] sm:$0xff]  ;;  %v359_v23 = vld [vmem:[#allocation7 + $0x78] sm:$0xff]  ;;  %p2148_p6 = pnand %p2147_p1, %p2802_p13  ;;  %s2150_s12 = sshll.u32 %s2232_s6, 4  ;;  %s2151_s12 = int_to_ptr.vmem [resolvable:$false] %s2150_s12 }
  0x97   : > { %v1802_v21 = vpack.c.bf16 %v357_v20, %v356_v19  ;;  %v1806_v24 = vpack.c.bf16 %v359_v23, %v358_v22  ;;  %v329_v25 = vld [vmem:[%s2493_s30 + $0x8] sm:$0xff]  ;;  %v330_v26 = vld [vmem:[%s2493_s30 + $0x10] sm:$0xff]  ;;  %v331_v27 = vld [vmem:[%s2493_s30 + $0x18] sm:$0xff]  ;;  %p2153_p4 = scmp.lt.s32.totalorder %s2725_s7, %s2151_s12 }
  0x98   : > { %v332_v28 = vld [vmem:[%s2493_s30 + $0x20] sm:$0xff]  ;;  %v333_v29 = vld [vmem:[%s2493_s30 + $0x28] sm:$0xff]  ;;  %v334_v30 = vld [vmem:[%s2493_s30 + $0x30] sm:$0xff]  ;;  %p2149_p10 = pneg %p2148_p6 }
  0x99   : > { %1785 = vmatpush3.bf16.msra.mxu0 %v1782_v5  ;;  %v335_v31 = vld [vmem:[%s2493_s30 + $0x38] sm:$0xff]  ;;  %v336_v32 = vld [vmem:[%s2493_s30 + $0x40] sm:$0xff]  ;;  %v337_v33 = vld [vmem:[%s2493_s30 + $0x48] sm:$0xff] }
  0x9a   : > { %1787 = vmatprep.subr.bf16.mxu0 %v1786_v8  ;;  %v338_v34 = vld [vmem:[%s2493_s30 + $0x50] sm:$0xff]  ;;  %v339_v35 = vld [vmem:[%s2493_s30 + $0x58] sm:$0xff]  ;;  %v340_v36 = vld [vmem:[%s2493_s30 + $0x60] sm:$0xff] }
  0x9b   : > { %v341_v37 = vld [vmem:[%s2493_s30 + $0x68] sm:$0xff]  ;;  %v342_v38 = vld [vmem:[%s2493_s30 + $0x70] sm:$0xff]  ;;  %v343_v39 = vld [vmem:[%s2493_s30 + $0x78] sm:$0xff]  ;;  %s2152_s30 = scalar_lea.vmem %s2151_s12, 4096 }
  0x9c   : > { %v2532_v40 = vld [vmem:[%s2501_s9] sm:$0xff]  ;;  %v506_v42 = vld [vmem:[#allocation8 + $0x8] sm:$0xff]  ;;  %v507_v43 = vld [vmem:[#allocation8 + $0x10] sm:$0xff]  ;;  %p2154_p5 = scmp.lt.s32.totalorder %s2152_s30, %s2146_s0 }
  0x9d   : > { %1789 = vmatpush3.bf16.msra.mxu0 %v1786_v8  ;;  %1586 = vmatprep.mubr.f32.mxu1 %v2532_v40  ;;  %v505_v41 = vld [vmem:[#allocation8] sm:$0xff]  ;;  %v508_v45 = vld [vmem:[#allocation8 + $0x18] sm:$0xff]  ;;  %v510_v48 = vld [vmem:[#allocation8 + $0x28] sm:$0xff] }
  0x9e   : > { %1791 = vmatprep.subr.bf16.mxu0 %v1790_v12  ;;  %v1842_v44 = vpack.c.bf16 %v506_v42, %v505_v41  ;;  %v1846_v46 = vpack.c.bf16 %v508_v45, %v507_v43  ;;  %v509_v47 = vld [vmem:[#allocation8 + $0x20] sm:$0xff]  ;;  %v511_v50 = vld [vmem:[#allocation8 + $0x30] sm:$0xff]  ;;  %v512_v51 = vld [vmem:[#allocation8 + $0x38] sm:$0xff]  ;;  %p2155_p3 = por %p2154_p5, %p2153_p4 }
  0x9f   : > { %v1850_v49 = vpack.c.bf16 %v510_v48, %v509_v47  ;;  %v1854_v52 = vpack.c.bf16 %v512_v51, %v511_v50  ;;  %v513_v53 = vld [vmem:[#allocation8 + $0x40] sm:$0xff]  ;;  %v514_v54 = vld [vmem:[#allocation8 + $0x48] sm:$0xff]  ;;  %v515_v56 = vld [vmem:[#allocation8 + $0x50] sm:$0xff] }
  0xa0   : > { %v1858_v55 = vpack.c.bf16 %v514_v54, %v513_v53  ;;  %v516_v57 = vld [vmem:[#allocation8 + $0x58] sm:$0xff]  ;;  %v517_v59 = vld [vmem:[#allocation8 + $0x60] sm:$0xff]  ;;  %v518_v60 = vld [vmem:[#allocation8 + $0x68] sm:$0xff]  ;;  %p2156_p7 = pnand %p2155_p3, %p2149_p10 }
  0xa1   : > { %1793 = vmatpush3.bf16.msra.mxu0 %v1790_v12  ;;  %v1862_v58 = vpack.c.bf16 %v516_v57, %v515_v56  ;;  %v1866_v61 = vpack.c.bf16 %v518_v60, %v517_v59  ;;  %v519_v62 = vld [vmem:[#allocation8 + $0x70] sm:$0xff]  ;;  %v520_v63 = vld [vmem:[#allocation8 + $0x78] sm:$0xff]  ;;  %v835_v56 = vld [vmem:[#allocation8 + $0x80] sm:$0xff] }
  0xa2   : > { %1795 = vmatprep.subr.bf16.mxu0 %v1794_v15  ;;  %v1870_v0 = vpack.c.bf16 %v520_v63, %v519_v62  ;;  %v836_v57 = vld [vmem:[#allocation8 + $0x88] sm:$0xff]  ;;  %v838_v60 = vld [vmem:[#allocation8 + $0x98] sm:$0xff]  ;;  %v839_v62 = vld [vmem:[#allocation8 + $0xa0] sm:$0xff] }
  0xa3   : > { %v2596_v59 = vpack.c.bf16 %v836_v57, %v835_v56  ;;  %v840_v63 = vld [vmem:[#allocation8 + $0xa8] sm:$0xff] }
  0xa5   : > { %1797 = vmatpush3.bf16.msra.mxu0 %v1794_v15 }
  0xa6   : > { %1799 = vmatprep.subr.bf16.mxu0 %v1798_v18 }
  0xa9   : > { %1801 = vmatpush3.bf16.msra.mxu0 %v1798_v18 }
  0xaa   : > { %1803 = vmatprep.subr.bf16.mxu0 %v1802_v21 }
  0xad   : > { %1805 = vmatpush3.bf16.msra.mxu0 %v1802_v21 }
  0xae   : > { %1807 = vmatprep.subr.bf16.mxu0 %v1806_v24 }
  0xb1   : > { %1809 = vmatpush3.bf16.msra.mxu0 %v1806_v24 }
  0xb2   : > { %1843 = vmatprep.subr.bf16.mxu0 %v1842_v44 }
  0xb4   : > { %1531 = vmatmul.mubr.f32.vlgmr.msra.gmra.mrb[0].mxu0 %v329_v25  ;;  %v2536_v25 = vld [vmem:[%s2501_s9 + $0x8] sm:$0xff] }
  0xb5   : > { %1533 = vmatprep.mubr.f32.mxu0 %v330_v26  ;;  %1845 = vmatpush3.bf16.msra.mxu0 %v1842_v44  ;;  %v2539_v26 = vld [vmem:[%s2501_s9 + $0x10] sm:$0xff] }
  0xb6   : > { %1847 = vmatprep.subr.bf16.mxu0 %v1846_v46 }
  0xb8   : > { %1534 = vmatmul.mubr.f32.gmra.mrb[2].mxu0 %v331_v27  ;;  %v2544_v27 = vld [vmem:[%s2501_s9 + $0x18] sm:$0xff] }
  0xb9   : > { %1536 = vmatprep.mubr.f32.mxu0 %v332_v28  ;;  %1849 = vmatpush3.bf16.msra.mxu0 %v1846_v46  ;;  %v2547_v28 = vld [vmem:[%s2501_s9 + $0x20] sm:$0xff] }
  0xba   : > { %1851 = vmatprep.subr.bf16.mxu0 %v1850_v49 }
  0xbc   : > { %1537 = vmatmul.mubr.f32.gmra.mrb[4].mxu0 %v333_v29  ;;  %v2552_v29 = vld [vmem:[%s2501_s9 + $0x28] sm:$0xff] }
  0xbd   : > { %1539 = vmatprep.mubr.f32.mxu0 %v334_v30  ;;  %1853 = vmatpush3.bf16.msra.mxu0 %v1850_v49  ;;  %v2555_v30 = vld [vmem:[%s2501_s9 + $0x30] sm:$0xff] }
  0xbe   : > { %1855 = vmatprep.subr.bf16.mxu0 %v1854_v52 }
  0xc0   : > { %1540 = vmatmul.mubr.f32.gmra.mrb[6].mxu0 %v335_v31  ;;  %v2560_v31 = vld [vmem:[%s2501_s9 + $0x38] sm:$0xff] }
  0xc1   : > { %1542 = vmatprep.mubr.f32.mxu0 %v336_v32  ;;  %1857 = vmatpush3.bf16.msra.mxu0 %v1854_v52  ;;  %v2563_v32 = vld [vmem:[%s2501_s9 + $0x40] sm:$0xff] }
  0xc2   : > { %1859 = vmatprep.subr.bf16.mxu0 %v1858_v55 }
  0xc4   : > { %1543 = vmatmul.mubr.f32.gmra.mrb[8].mxu0 %v337_v33  ;;  %v2568_v33 = vld [vmem:[%s2501_s9 + $0x48] sm:$0xff] }
  0xc5   : > { %1545 = vmatprep.mubr.f32.mxu0 %v338_v34  ;;  %1861 = vmatpush3.bf16.msra.mxu0 %v1858_v55  ;;  %v2571_v34 = vld [vmem:[%s2501_s9 + $0x50] sm:$0xff] }
  0xc6   : > { %1863 = vmatprep.subr.bf16.mxu0 %v1862_v58 }
  0xc8   : > { %1546 = vmatmul.mubr.f32.gmra.mrb[10].mxu0 %v339_v35  ;;  %v2576_v35 = vld [vmem:[%s2501_s9 + $0x58] sm:$0xff] }
  0xc9   : > { %1548 = vmatprep.mubr.f32.mxu0 %v340_v36  ;;  %1865 = vmatpush3.bf16.msra.mxu0 %v1862_v58  ;;  %v2579_v36 = vld [vmem:[%s2501_s9 + $0x60] sm:$0xff]  ;;  %v837_v58 = vld [vmem:[#allocation8 + $0x90] sm:$0xff] }
  0xca   : > { %1867 = vmatprep.subr.bf16.mxu0 %v1866_v61 }
  0xcc   : > { %1549 = vmatmul.mubr.f32.gmra.mrb[12].mxu0 %v341_v37  ;;  %v2584_v37 = vld [vmem:[%s2501_s9 + $0x68] sm:$0xff] }
  0xcd   : > { %1551 = vmatprep.mubr.f32.mxu0 %v342_v38  ;;  %1869 = vmatpush3.bf16.msra.mxu0 %v1866_v61  ;;  %v2587_v38 = vld [vmem:[%s2501_s9 + $0x70] sm:$0xff]  ;;  %v2598_v61 = vpack.c.bf16 %v838_v60, %v837_v58 }
  0xce   : > { %1871 = vmatprep.subr.bf16.mxu0 %v1870_v0 }
  0xd0   : > { %1552 = vmatmul.mubr.f32.gmra.mrb[14].mxu0 %v343_v39  ;;  %v2592_v39 = vld [vmem:[%s2501_s9 + $0x78] sm:$0xff] }
  0xd1   : > { %1873 = vmatpush3.bf16.msra.mxu0 %v1870_v0  ;;  %v2603_v0 = vpack.c.bf16 %v840_v63, %v839_v62 }
  0xd2   : > { %1907 = vmatprep.subr.bf16.mxu0 %v2596_v59 }
 0x187   : > { %v1532_v1 = vpop.f32.mrb[0].mxu0 }
 0x188   : > { %v426_v2 = vpop.f32.mrb[1].mxu0 }
 0x189   : > { %v1810_v3 = vpack.c.bf16 %v1532_v1, %v426_v2  ;;  %v841_v1 = vld [vmem:[#allocation8 + $0xb0] sm:$0xff]  ;;  %v842_v2 = vld [vmem:[#allocation8 + $0xb8] sm:$0xff] }
 0x18b   : > { %v1535_v4 = vpop.f32.mrb[2].mxu0  ;;  %1811 = vmatprep.subr.bf16.mxu1 %v1810_v3 }
 0x18c   : > { %v436_v5 = vpop.f32.mrb[3].mxu0  ;;  %1813 = vmatpush3.bf16.msra.mxu1 %v1810_v3  ;;  %v2607_v3 = vpack.c.bf16 %v842_v2, %v841_v1 }
 0x18d   : > { %v1814_v6 = vpack.c.bf16 %v1535_v4, %v436_v5  ;;  %v843_v4 = vld [vmem:[#allocation8 + $0xc0] sm:$0xff]  ;;  %v844_v5 = vld [vmem:[#allocation8 + $0xc8] sm:$0xff] }
 0x18f   : > { %v1538_v7 = vpop.f32.mrb[4].mxu0  ;;  %1815 = vmatprep.subr.bf16.mxu1 %v1814_v6 }
 0x190   : > { %v446_v8 = vpop.f32.mrb[5].mxu0  ;;  %1817 = vmatpush3.bf16.msra.mxu1 %v1814_v6  ;;  %v2611_v6 = vpack.c.bf16 %v844_v5, %v843_v4 }
 0x191   : > { %v1818_v9 = vpack.c.bf16 %v1538_v7, %v446_v8  ;;  %v845_v7 = vld [vmem:[#allocation8 + $0xd0] sm:$0xff]  ;;  %v846_v8 = vld [vmem:[#allocation8 + $0xd8] sm:$0xff] }
 0x193   : > { %v1541_v10 = vpop.f32.mrb[6].mxu0  ;;  %1819 = vmatprep.subr.bf16.mxu1 %v1818_v9 }
 0x194   : > { %v456_v11 = vpop.f32.mrb[7].mxu0  ;;  %1821 = vmatpush3.bf16.msra.mxu1 %v1818_v9  ;;  %v2615_v9 = vpack.c.bf16 %v846_v8, %v845_v7 }
 0x195   : > { %v1822_v12 = vpack.c.bf16 %v1541_v10, %v456_v11  ;;  %v847_v10 = vld [vmem:[#allocation8 + $0xe0] sm:$0xff]  ;;  %v848_v11 = vld [vmem:[#allocation8 + $0xe8] sm:$0xff] }
 0x197   : > { %v1544_v13 = vpop.f32.mrb[8].mxu0  ;;  %1823 = vmatprep.subr.bf16.mxu1 %v1822_v12 }
 0x198   : > { %v466_v14 = vpop.f32.mrb[9].mxu0  ;;  %1825 = vmatpush3.bf16.msra.mxu1 %v1822_v12  ;;  %v2619_v12 = vpack.c.bf16 %v848_v11, %v847_v10 }
 0x199   : > { %v1826_v15 = vpack.c.bf16 %v1544_v13, %v466_v14  ;;  %v849_v13 = vld [vmem:[#allocation8 + $0xf0] sm:$0xff]  ;;  %v850_v14 = vld [vmem:[#allocation8 + $0xf8] sm:$0xff] }
 0x19b   : > { %v1547_v16 = vpop.f32.mrb[10].mxu0  ;;  %1827 = vmatprep.subr.bf16.mxu1 %v1826_v15 }
 0x19c   : > { %v476_v17 = vpop.f32.mrb[11].mxu0  ;;  %1829 = vmatpush3.bf16.msra.mxu1 %v1826_v15  ;;  %v2623_v15 = vpack.c.bf16 %v850_v14, %v849_v13 }
 0x19d   : > { %v1830_v18 = vpack.c.bf16 %v1547_v16, %v476_v17  ;;  %v2631_v16 = vld [vmem:[%s2775_s4] ss:$0 sm:$0xff] }
 0x19f   : > { %v1550_v19 = vpop.f32.mrb[12].mxu0  ;;  %1831 = vmatprep.subr.bf16.mxu1 %v1830_v18 }
 0x1a0   : > { %v486_v20 = vpop.f32.mrb[13].mxu0  ;;  %1833 = vmatpush3.bf16.msra.mxu1 %v1830_v18 }
 0x1a1   : > { %v1834_v21 = vpack.c.bf16 %v1550_v19, %v486_v20 }
 0x1a3   : > { %v1553_v22 = vpop.f32.mrb[14].mxu0  ;;  %1835 = vmatprep.subr.bf16.mxu1 %v1834_v21 }
 0x1a4   : > { %v496_v23 = vpop.f32.mrb[15].mxu0  ;;  %1837 = vmatpush3.bf16.msra.mxu1 %v1834_v21 }
 0x1a5   : > { %v1838_v24 = vpack.c.bf16 %v1553_v22, %v496_v23 }
 0x1a7   : > { %1839 = vmatprep.subr.bf16.mxu1 %v1838_v24 }
 0x1a8   : > { %1841 = vmatpush3.bf16.msra.mxu1 %v1838_v24 }
 0x1ab   : > { %1587 = vmatmul.mubr.f32.vlgmr.msra.gmra.mrb[0].mxu1 %v2536_v25 }
 0x1ac   : > { %1589 = vmatprep.mubr.f32.mxu1 %v2539_v26 }
 0x1af   : > { %1590 = vmatmul.mubr.f32.gmra.mrb[2].mxu1 %v2544_v27 }
 0x1b0   : > { %1592 = vmatprep.mubr.f32.mxu1 %v2547_v28 }
 0x1b3   : > { %1593 = vmatmul.mubr.f32.gmra.mrb[4].mxu1 %v2552_v29 }
 0x1b4   : > { %1595 = vmatprep.mubr.f32.mxu1 %v2555_v30 }
 0x1b7   : > { %1596 = vmatmul.mubr.f32.gmra.mrb[6].mxu1 %v2560_v31 }
 0x1b8   : > { %1598 = vmatprep.mubr.f32.mxu1 %v2563_v32 }
 0x1bb   : > { %1599 = vmatmul.mubr.f32.gmra.mrb[8].mxu1 %v2568_v33 }
 0x1bc   : > { %1601 = vmatprep.mubr.f32.mxu1 %v2571_v34 }
 0x1bf   : > { %1602 = vmatmul.mubr.f32.gmra.mrb[10].mxu1 %v2576_v35 }
 0x1c0   : > { %1604 = vmatprep.mubr.f32.mxu1 %v2579_v36 }
 0x1c3   : > { %1605 = vmatmul.mubr.f32.gmra.mrb[12].mxu1 %v2584_v37 }
 0x1c4   : > { %1607 = vmatprep.mubr.f32.mxu1 %v2587_v38 }
 0x1c7   : > { %1608 = vmatmul.mubr.f32.gmra.mrb[14].mxu1 %v2592_v39 }
 0x1c8   : > { %1698 = vmatprep.mubr.f32.mxu1 %v2532_v40 }
 0x27e   : > { %v1588_v41 = vpop.f32.mrb[0].mxu1 }
 0x27f   : > { %v588_v42 = vpop.f32.mrb[1].mxu1 }
 0x280   : > { %1642 = vmatprep.mubr.f32.mxu0 %v588_v42 }
 0x281   : > { %1643 = vmatmul.mubr.f32.vlgmr.msra.gmra.mrb[16].mxu0 %v1588_v41 }
 0x282   : > { %v1591_v43 = vpop.f32.mrb[2].mxu1  ;;  %1909 = vmatpush3.bf16.msra.mxu0 %v2596_v59 }
 0x283   : > { %v598_v44 = vpop.f32.mrb[3].mxu1  ;;  %1911 = vmatprep.subr.bf16.mxu0 %v2598_v61 }
 0x284   : > { %1645 = vmatprep.mubr.f32.mxu0 %v598_v44 }
 0x285   : > { %1646 = vmatmul.mubr.f32.gmra.mrb[18].mxu0 %v1591_v43 }
 0x286   : > { %v1594_v45 = vpop.f32.mrb[4].mxu1  ;;  %1913 = vmatpush3.bf16.msra.mxu0 %v2598_v61 }
 0x287   : > { %v608_v46 = vpop.f32.mrb[5].mxu1  ;;  %1915 = vmatprep.subr.bf16.mxu0 %v2603_v0 }
 0x288   : > { %1648 = vmatprep.mubr.f32.mxu0 %v608_v46 }
 0x289   : > { %1649 = vmatmul.mubr.f32.gmra.mrb[20].mxu0 %v1594_v45 }
 0x28a   : > { %v1597_v47 = vpop.f32.mrb[6].mxu1  ;;  %1917 = vmatpush3.bf16.msra.mxu0 %v2603_v0 }
 0x28b   : > { %v618_v48 = vpop.f32.mrb[7].mxu1  ;;  %1919 = vmatprep.subr.bf16.mxu0 %v2607_v3 }
 0x28c   : > { %1651 = vmatprep.mubr.f32.mxu0 %v618_v48 }
 0x28d   : > { %1652 = vmatmul.mubr.f32.gmra.mrb[22].mxu0 %v1597_v47 }
 0x28e   : > { %v1600_v49 = vpop.f32.mrb[8].mxu1  ;;  %1921 = vmatpush3.bf16.msra.mxu0 %v2607_v3 }
 0x28f   : > { %v628_v50 = vpop.f32.mrb[9].mxu1  ;;  %1923 = vmatprep.subr.bf16.mxu0 %v2611_v6 }
 0x290   : > { %1654 = vmatprep.mubr.f32.mxu0 %v628_v50 }
 0x291   : > { %1655 = vmatmul.mubr.f32.gmra.mrb[24].mxu0 %v1600_v49 }
 0x292   : > { %v1603_v40 = vpop.f32.mrb[10].mxu1  ;;  %1925 = vmatpush3.bf16.msra.mxu0 %v2611_v6 }
 0x293   : > { %v638_v51 = vpop.f32.mrb[11].mxu1  ;;  %1927 = vmatprep.subr.bf16.mxu0 %v2615_v9 }
 0x294   : > { %1657 = vmatprep.mubr.f32.mxu0 %v638_v51 }
 0x295   : > { %1658 = vmatmul.mubr.f32.gmra.mrb[26].mxu0 %v1603_v40 }
 0x296   : > { %v1606_v52 = vpop.f32.mrb[12].mxu1  ;;  %1929 = vmatpush3.bf16.msra.mxu0 %v2615_v9 }
 0x297   : > { %v648_v53 = vpop.f32.mrb[13].mxu1  ;;  %1931 = vmatprep.subr.bf16.mxu0 %v2619_v12 }
 0x298   : > { %1660 = vmatprep.mubr.f32.mxu0 %v648_v53 }
 0x299   : > { %1661 = vmatmul.mubr.f32.gmra.mrb[28].mxu0 %v1606_v52 }
 0x29a   : > { %v1609_v54 = vpop.f32.mrb[14].mxu1  ;;  %1933 = vmatpush3.bf16.msra.mxu0 %v2619_v12 }
 0x29b   : > { %v658_v55 = vpop.f32.mrb[15].mxu1  ;;  %1935 = vmatprep.subr.bf16.mxu0 %v2623_v15 }
 0x29c   : > { %1663 = vmatprep.mubr.f32.mxu0 %v658_v55 }
 0x29d   : > { %1664 = vmatmul.mubr.f32.gmra.mrb[30].mxu0 %v1609_v54 }
 0x29e   : > { %1937 = vmatpush3.bf16.msra.mxu0 %v2623_v15 }
 0x354   : > { %v1644_v17 = vpop.f32.mrb[16].mxu0 }
 0x355   : > { %v745_v18 = vadd.f32 %v1644_v17, %v2631_v16  ;;  %v739_v19 = vpop.f32.mrb[17].mxu0 }
 0x356   : > { %v740_v20 = vadd.f32 %v2631_v16, %v739_v19 }
 0x357   : > { %v819_v21 = vmax.f32 %v745_v18, 0.0 }
 0x358   : > { %v818_v22 = vmax.f32 %v740_v20, 0.0  ;;  %v1647_v23 = vpop.f32.mrb[18].mxu0 }
 0x359   : > { %v755_v24 = vadd.f32 %v1647_v23, %v2631_v16  ;;  %v749_v41 = vpop.f32.mrb[19].mxu0 }
 0x35a   : > { %v1874_v42 = vpack.c.bf16 %v819_v21, %v818_v22  ;;  %v750_v43 = vadd.f32 %v2631_v16, %v749_v41 }
 0x35b   : > { %v821_v44 = vmax.f32 %v755_v24, 0.0 }
 0x35c   : > { %v820_v45 = vmax.f32 %v750_v43, 0.0  ;;  %v1650_v46 = vpop.f32.mrb[20].mxu0  ;;  %1875 = vmatprep.subr.bf16.mxu1 %v1874_v42 }
 0x35d   : > { %v765_v47 = vadd.f32 %v1650_v46, %v2631_v16  ;;  %v759_v48 = vpop.f32.mrb[21].mxu0  ;;  %1877 = vmatpush3.bf16.msra.mxu1 %v1874_v42 }
 0x35e   : > { %v1878_v49 = vpack.c.bf16 %v821_v44, %v820_v45  ;;  %v760_v50 = vadd.f32 %v2631_v16, %v759_v48 }
 0x35f   : > { %v823_v40 = vmax.f32 %v765_v47, 0.0 }
 0x360   : > { %v822_v51 = vmax.f32 %v760_v50, 0.0  ;;  %v1653_v52 = vpop.f32.mrb[22].mxu0  ;;  %1879 = vmatprep.subr.bf16.mxu1 %v1878_v49 }
 0x361   : > { %v775_v53 = vadd.f32 %v1653_v52, %v2631_v16  ;;  %v769_v54 = vpop.f32.mrb[23].mxu0  ;;  %1881 = vmatpush3.bf16.msra.mxu1 %v1878_v49 }
 0x362   : > { %v1882_v55 = vpack.c.bf16 %v823_v40, %v822_v51  ;;  %v770_v56 = vadd.f32 %v2631_v16, %v769_v54 }
 0x363   : > { %v825_v57 = vmax.f32 %v775_v53, 0.0 }
 0x364   : > { %v824_v58 = vmax.f32 %v770_v56, 0.0  ;;  %v1656_v60 = vpop.f32.mrb[24].mxu0  ;;  %1883 = vmatprep.subr.bf16.mxu1 %v1882_v55 }
 0x365   : > { %v785_v62 = vadd.f32 %v1656_v60, %v2631_v16  ;;  %v779_v63 = vpop.f32.mrb[25].mxu0  ;;  %1885 = vmatpush3.bf16.msra.mxu1 %v1882_v55 }
 0x366   : > { %v1886_v1 = vpack.c.bf16 %v825_v57, %v824_v58  ;;  %v780_v2 = vadd.f32 %v2631_v16, %v779_v63 }
 0x367   : > { %v827_v4 = vmax.f32 %v785_v62, 0.0 }
 0x368   : > { %v826_v5 = vmax.f32 %v780_v2, 0.0  ;;  %v1659_v7 = vpop.f32.mrb[26].mxu0  ;;  %1887 = vmatprep.subr.bf16.mxu1 %v1886_v1 }
 0x369   : > { %v795_v8 = vadd.f32 %v1659_v7, %v2631_v16  ;;  %v789_v10 = vpop.f32.mrb[27].mxu0  ;;  %1889 = vmatpush3.bf16.msra.mxu1 %v1886_v1 }
 0x36a   : > { %v1890_v11 = vpack.c.bf16 %v827_v4, %v826_v5  ;;  %v790_v13 = vadd.f32 %v2631_v16, %v789_v10 }
 0x36b   : > { %v829_v14 = vmax.f32 %v795_v8, 0.0 }
 0x36c   : > { %v828_v17 = vmax.f32 %v790_v13, 0.0  ;;  %v1662_v18 = vpop.f32.mrb[28].mxu0  ;;  %1891 = vmatprep.subr.bf16.mxu1 %v1890_v11 }
 0x36d   : > { %v805_v19 = vadd.f32 %v1662_v18, %v2631_v16  ;;  %v799_v20 = vpop.f32.mrb[29].mxu0  ;;  %1893 = vmatpush3.bf16.msra.mxu1 %v1890_v11 }
 0x36e   : > { %v1894_v21 = vpack.c.bf16 %v829_v14, %v828_v17  ;;  %v800_v22 = vadd.f32 %v2631_v16, %v799_v20 }
 0x36f   : > { %v831_v23 = vmax.f32 %v805_v19, 0.0 }
 0x370   : > { %v830_v24 = vmax.f32 %v800_v22, 0.0  ;;  %v1665_v41 = vpop.f32.mrb[30].mxu0  ;;  %1895 = vmatprep.subr.bf16.mxu1 %v1894_v21 }
 0x371   : > { %v815_v42 = vadd.f32 %v1665_v41, %v2631_v16  ;;  %v809_v43 = vpop.f32.mrb[31].mxu0  ;;  %1897 = vmatpush3.bf16.msra.mxu1 %v1894_v21 }
 0x372   : > { %v1898_v44 = vpack.c.bf16 %v831_v23, %v830_v24  ;;  %v810_v45 = vadd.f32 %v2631_v16, %v809_v43 }
 0x373   : > { %v833_v46 = vmax.f32 %v815_v42, 0.0 }
 0x374   : > { %v832_v47 = vmax.f32 %v810_v45, 0.0  ;;  %1899 = vmatprep.subr.bf16.mxu1 %v1898_v44 }
 0x375   : > { %1901 = vmatpush3.bf16.msra.mxu1 %v1898_v44 }
 0x376   : > { %v1902_v48 = vpack.c.bf16 %v833_v46, %v832_v47 }
 0x378   : > { %1903 = vmatprep.subr.bf16.mxu1 %v1902_v48 }
 0x379   : > { %1905 = vmatpush3.bf16.msra.mxu1 %v1902_v48 }
 0x37a   : > { %1938 = vmatprep.subr.bf16.mxu1 %v2596_v59 }
 0x37c   : > { %1699 = vmatmul.mubr.f32.vlgmr.msra.gmra.mrb[16].mxu1 %v2536_v25 }
 0x37d   : > { %1701 = vmatprep.mubr.f32.mxu1 %v2539_v26  ;;  %1946 = vmatpush3.bf16.msra.mxu1 %v2596_v59 }
 0x37e   : > { %1939 = vmatprep.subr.bf16.mxu1 %v2598_v61 }
 0x380   : > { %1702 = vmatmul.mubr.f32.gmra.mrb[18].mxu1 %v2544_v27 }
 0x381   : > { %1704 = vmatprep.mubr.f32.mxu1 %v2547_v28  ;;  %1947 = vmatpush3.bf16.msra.mxu1 %v2598_v61  ;;  %v2683_v61 = vld [vmem:[%s2775_s4 + $0x1] ss:$0 sm:$0xff] }
 0x382   : > { %1940 = vmatprep.subr.bf16.mxu1 %v2603_v0 }
 0x384   : > { %1705 = vmatmul.mubr.f32.gmra.mrb[20].mxu1 %v2552_v29 }
 0x385   : > { %1707 = vmatprep.mubr.f32.mxu1 %v2555_v30  ;;  %1948 = vmatpush3.bf16.msra.mxu1 %v2603_v0 }
 0x386   : > { %1941 = vmatprep.subr.bf16.mxu1 %v2607_v3 }
 0x388   : > { %1708 = vmatmul.mubr.f32.gmra.mrb[22].mxu1 %v2560_v31 }
 0x389   : > { %1710 = vmatprep.mubr.f32.mxu1 %v2563_v32  ;;  %1949 = vmatpush3.bf16.msra.mxu1 %v2607_v3 }
 0x38a   : > { %1942 = vmatprep.subr.bf16.mxu1 %v2611_v6 }
 0x38c   : > { %1711 = vmatmul.mubr.f32.gmra.mrb[24].mxu1 %v2568_v33 }
 0x38d   : > { %1713 = vmatprep.mubr.f32.mxu1 %v2571_v34  ;;  %1950 = vmatpush3.bf16.msra.mxu1 %v2611_v6 }
 0x38e   : > { %1943 = vmatprep.subr.bf16.mxu1 %v2615_v9 }
 0x390   : > { %1714 = vmatmul.mubr.f32.gmra.mrb[26].mxu1 %v2576_v35 }
 0x391   : > { %1716 = vmatprep.mubr.f32.mxu1 %v2579_v36  ;;  %1951 = vmatpush3.bf16.msra.mxu1 %v2615_v9 }
 0x392   : > { %1944 = vmatprep.subr.bf16.mxu1 %v2619_v12 }
 0x394   : > { %1717 = vmatmul.mubr.f32.gmra.mrb[28].mxu1 %v2584_v37 }
 0x395   : > { %1719 = vmatprep.mubr.f32.mxu1 %v2587_v38  ;;  %1952 = vmatpush3.bf16.msra.mxu1 %v2619_v12 }
 0x396   : > { %1945 = vmatprep.subr.bf16.mxu1 %v2623_v15 }
 0x398   : > { %1720 = vmatmul.mubr.f32.gmra.mrb[30].mxu1 %v2592_v39 }
 0x399   : > { %1953 = vmatpush3.bf16.msra.mxu1 %v2623_v15 }
 0x44f   : > { %v1700_v25 = vpop.f32.mrb[16].mxu1 }
 0x450   : > { %v919_v26 = vpop.f32.mrb[17].mxu1 }
 0x451   : > { %1754 = vmatprep.mubr.f32.mxu0 %v919_v26 }
 0x452   : > { %1755 = vmatmul.mubr.f32.vlgmr.msra.gmra.mrb[32].mxu0 %v1700_v25 }
 0x453   : > { %v1703_v27 = vpop.f32.mrb[18].mxu1 }
 0x454   : > { %v929_v28 = vpop.f32.mrb[19].mxu1 }
 0x455   : > { %1757 = vmatprep.mubr.f32.mxu0 %v929_v28 }
 0x456   : > { %1758 = vmatmul.mubr.f32.gmra.mrb[34].mxu0 %v1703_v27 }
 0x457   : > { %v1706_v29 = vpop.f32.mrb[20].mxu1 }
 0x458   : > { %v939_v30 = vpop.f32.mrb[21].mxu1 }
 0x459   : > { %1760 = vmatprep.mubr.f32.mxu0 %v939_v30 }
 0x45a   : > { %1761 = vmatmul.mubr.f32.gmra.mrb[36].mxu0 %v1706_v29 }
 0x45b   : > { %v1709_v31 = vpop.f32.mrb[22].mxu1 }
 0x45c   : > { %v949_v32 = vpop.f32.mrb[23].mxu1 }
 0x45d   : > { %1763 = vmatprep.mubr.f32.mxu0 %v949_v32 }
 0x45e   : > { %1764 = vmatmul.mubr.f32.gmra.mrb[38].mxu0 %v1709_v31 }
 0x45f   : > { %v1712_v33 = vpop.f32.mrb[24].mxu1 }
 0x460   : > { %v959_v34 = vpop.f32.mrb[25].mxu1 }
 0x461   : > { %1766 = vmatprep.mubr.f32.mxu1 %v959_v34 }
 0x462   : > { %1767 = vmatmul.mubr.f32.vlgmr.msra.gmra.mrb[32].mxu1 %v1712_v33 }
 0x463   : > { %v1715_v35 = vpop.f32.mrb[26].mxu1 }
 0x464   : > { %v969_v36 = vpop.f32.mrb[27].mxu1 }
 0x465   : > { %1769 = vmatprep.mubr.f32.mxu1 %v969_v36 }
 0x466   : > { %1770 = vmatmul.mubr.f32.gmra.mrb[34].mxu1 %v1715_v35 }
 0x467   : > { %v1718_v37 = vpop.f32.mrb[28].mxu1 }
 0x468   : > { %v979_v38 = vpop.f32.mrb[29].mxu1 }
 0x469   : > { %1772 = vmatprep.mubr.f32.mxu1 %v979_v38 }
 0x46a   : > { %1773 = vmatmul.mubr.f32.gmra.mrb[36].mxu1 %v1718_v37 }
 0x46b   : > { %v1721_v39 = vpop.f32.mrb[30].mxu1 }
 0x46c   : > { %v989_v59 = vpop.f32.mrb[31].mxu1 }
 0x46d   : > { %1775 = vmatprep.mubr.f32.mxu1 %v989_v59 }
 0x46e   : > { %1776 = vmatmul.mubr.f32.gmra.mrb[38].mxu1 %v1721_v39 }
 0x525   : > { %v1756_v0 = vpop.f32.mrb[32].mxu0 }
 0x526   : > { %v1076_v3 = vadd.f32 %v1756_v0, %v2683_v61  ;;  %v1070_v6 = vpop.f32.mrb[33].mxu0 }
 0x527   : > { %v1071_v9 = vadd.f32 %v2683_v61, %v1070_v6 }
 0x528   : > { %v1150_v12 = vmax.f32 %v1076_v3, 0.0 }
 0x529   : > { %v1149_v15 = vmax.f32 %v1071_v9, 0.0  ;;  %v1759_v16 = vpop.f32.mrb[34].mxu0 }
 0x52a   : > { %1166 = vst [vmem:[%s2688_s2 + $0x8] sm:$0xff] %v1150_v12  ;;  %v1086_v49 = vadd.f32 %v1759_v16, %v2683_v61  ;;  %v1080_v50 = vpop.f32.mrb[35].mxu0 }
 0x52b   : > { %1165 = vst [vmem:[%s2688_s2] sm:$0xff] %v1149_v15  ;;  %v1081_v40 = vadd.f32 %v2683_v61, %v1080_v50 }
 0x52c   : > { %v1152_v51 = vmax.f32 %v1086_v49, 0.0 }
 0x52d   : > { %v1151_v52 = vmax.f32 %v1081_v40, 0.0  ;;  %v1762_v53 = vpop.f32.mrb[36].mxu0 }
 0x52e   : > { %1168 = vst [vmem:[%s2688_s2 + $0x18] sm:$0xff] %v1152_v51  ;;  %v1096_v54 = vadd.f32 %v1762_v53, %v2683_v61  ;;  %v1090_v55 = vpop.f32.mrb[37].mxu0 }
 0x52f   : > { %1167 = vst [vmem:[%s2688_s2 + $0x10] sm:$0xff] %v1151_v52  ;;  %v1091_v56 = vadd.f32 %v2683_v61, %v1090_v55 }
 0x530   : > { %v1154_v57 = vmax.f32 %v1096_v54, 0.0 }
 0x531   : > { %v1153_v58 = vmax.f32 %v1091_v56, 0.0  ;;  %v1765_v60 = vpop.f32.mrb[38].mxu0 }
 0x532   : > { %1170 = vst [vmem:[%s2688_s2 + $0x28] sm:$0xff] %v1154_v57  ;;  %v1106_v62 = vadd.f32 %v1765_v60, %v2683_v61  ;;  %v1100_v63 = vpop.f32.mrb[39].mxu0 }
 0x533   : > { %1169 = vst [vmem:[%s2688_s2 + $0x20] sm:$0xff] %v1153_v58  ;;  %v1101_v1 = vadd.f32 %v2683_v61, %v1100_v63 }
 0x534   : > { %v1156_v2 = vmax.f32 %v1106_v62, 0.0 }
 0x535   : > { %v1155_v4 = vmax.f32 %v1101_v1, 0.0  ;;  %v1768_v5 = vpop.f32.mrb[32].mxu1 }
 0x536   : > { %1172 = vst [vmem:[%s2688_s2 + $0x38] sm:$0xff] %v1156_v2  ;;  %v1116_v7 = vadd.f32 %v1768_v5, %v2683_v61  ;;  %v1110_v8 = vpop.f32.mrb[33].mxu1 }
 0x537   : > { %1171 = vst [vmem:[%s2688_s2 + $0x30] sm:$0xff] %v1155_v4  ;;  %v1111_v10 = vadd.f32 %v2683_v61, %v1110_v8 }
 0x538   : > { %v1158_v11 = vmax.f32 %v1116_v7, 0.0 }
 0x539   : > { %v1157_v13 = vmax.f32 %v1111_v10, 0.0  ;;  %v1771_v14 = vpop.f32.mrb[34].mxu1 }
 0x53a   : > { %1174 = vst [vmem:[%s2688_s2 + $0x48] sm:$0xff] %v1158_v11  ;;  %v1126_v17 = vadd.f32 %v1771_v14, %v2683_v61  ;;  %v1120_v18 = vpop.f32.mrb[35].mxu1 }
 0x53b   : > { %1173 = vst [vmem:[%s2688_s2 + $0x40] sm:$0xff] %v1157_v13  ;;  %v1121_v19 = vadd.f32 %v2683_v61, %v1120_v18 }
 0x53c   : > { %v1160_v20 = vmax.f32 %v1126_v17, 0.0 }
 0x53d   : > { %v1159_v21 = vmax.f32 %v1121_v19, 0.0  ;;  %v1774_v22 = vpop.f32.mrb[36].mxu1 }
 0x53e   : > { %1176 = vst [vmem:[%s2688_s2 + $0x58] sm:$0xff] %v1160_v20  ;;  %v1136_v23 = vadd.f32 %v1774_v22, %v2683_v61  ;;  %v1130_v24 = vpop.f32.mrb[37].mxu1 }
 0x53f   : > { %1175 = vst [vmem:[%s2688_s2 + $0x50] sm:$0xff] %v1159_v21  ;;  %v1131_v41 = vadd.f32 %v2683_v61, %v1130_v24 }
 0x540   : > { %v1162_v42 = vmax.f32 %v1136_v23, 0.0 }
 0x541   : > { %v1161_v43 = vmax.f32 %v1131_v41, 0.0  ;;  %v1777_v44 = vpop.f32.mrb[38].mxu1 }
 0x542   : > { %1178 = vst [vmem:[%s2688_s2 + $0x68] sm:$0xff] %v1162_v42  ;;  %v1146_v45 = vadd.f32 %v1777_v44, %v2683_v61  ;;  %v1140_v46 = vpop.f32.mrb[39].mxu1 }
 0x543   : > { %1177 = vst [vmem:[%s2688_s2 + $0x60] sm:$0xff] %v1161_v43  ;;  %v1141_v47 = vadd.f32 %v2683_v61, %v1140_v46 }
 0x544   : > { %v1164_v48 = vmax.f32 %v1146_v45, 0.0 }
 0x545   : > { %v1163_v25 = vmax.f32 %v1141_v47, 0.0 }
 0x546   : > { %1180 = vst [vmem:[%s2688_s2 + $0x78] sm:$0xff] %v1164_v48 }
 0x547   : > { %1179 = vst [vmem:[%s2688_s2 + $0x70] sm:$0xff] %v1163_v25 }
 0x548   : > { %2159 = shalt.err (!%p2156_p7)
}
 0x549   : > { %s2160_s26 = scalar_lea.hbm %s2723_s28, 2048  ;;  %s2164_s24 = scalar_lea.hbm %s2776_s5, 4096 }
 0x54a   : > { %p2161_p9 = scmp.ne.s32.totalorder %s2723_s28, %s2160_s26  ;;  %p2165_p11 = scmp.lt.u32.totalorder %s2723_s28, %s2776_s5 }
 0x54b   : > { %p2166_p2 = scmp.lt.u32.totalorder %s2164_s24, %s2160_s26  ;;  %p2168_p1 = scmp.lt.u32.totalorder %s2160_s26, %s2723_s28 }
 0x54c   : > { %p2162_p0 = pnand %p2161_p9, %p2802_p13 }
 0x54d   : > { %p2167_p12 = por %p2166_p2, %p2165_p11 }
 0x54e   : > { %p2163_p8 = pneg %p2162_p0 }
 0x54f   : > { %p2169_p6 = por %p2168_p1, %p2167_p12 }
 0x551   : > { %p2170_p10 = pnand %p2169_p6, %p2163_p8 }
 0x553   : > { %2173 = shalt.err (!%p2170_p10)
}
 0x554   : > { %s2233_s14 = smov 128   ;;  %s2234_s2 = smov 8  }
 0x555   : > { %1966 = dma.vmem_to_hbm [thread:$0]  (%p2802_p13), %s2725_s7, 2048, %s2723_s28, %s1182_s22, %s2233_s14, %s2233_s14, %s2234_s2  }
 0x556 PF: > { %s1210_s16 = sand.u32 1, %s2212_s18   ;;  %p2803_p4 = scmp.ne.s32.totalorder %s2787_s25, 0 }
 0x557   : > { %p2804_p5 = scmp.ge.s32.totalorder %s2224_s21, 2  ;;  %s1211_s15 = scalar_lea.sflag [#allocation4], %s1210_s16 }
 0x559   : > { %p1983_p3 = pnand %p2804_p5, %p2803_p4 }
 0x55b   : > { %2207 = dma.done.wait (!%p1983_p3), %s1211_s15, 2048  }
 0x55c   : > { %2209 = vsyncadd (!%p1983_p3), %s1211_s15, 4294965248  ;;  %p22_p7 = scmp.ge.s32.totalorder %s2381_s29, 4   ;;  %s2805_s18 = smov %s2216_s19 }
 0x55d   : > { %s2806_s19 = smov %s2220_s20  ;;  %s2807_s20 = smov %s2397_s27 }
 0x55e   : > { %s2808_s21 = smov %s2381_s29  ;;  %24 = sbr.rel (!%p22_p7) target bundleno = 11 (0xb), region = 108 }
 0x565   :  { %1216 = vsyncpa [#allocation3], 1 }
 0x566   :  { %1218 = vsyncpa [#allocation3 + $0x1], 1 }
 0x567   :  { %1219 = vsyncpa [#allocation6], 1 }
 0x568   :  { %1221 = vsyncpa [#allocation6 + $0x1], 1 }
 0x569   :  { %1222 = vsyncpa [#allocation9], 1 }
 0x56a   :  { %1223 = vsyncpa [#allocation4], 1 }
 0x56b   :  { %1225 = vsyncpa [#allocation4 + $0x1], 1 }

</bundles_post_ra>
